<compile_context>
chip_gen: v6e
topology: v6e:2x2x1
jax: 0.10.0
libtpu: 0.0.40
codegen_flags: <defaults>
</compile_context>

<pallas_src>
import jax
import jax.numpy as jnp
from jax.experimental import pallas as pl
from jax.experimental.pallas import tpu as pltpu


def _prediction_kernel(a_ref, c_ref, wa_ref, wc_ref, b_ref, wl_ref, out_ref):
    # a_ref : (TM, Dc) bf16   rows = flattened (batch, position)
    # c_ref : (TM, De) bf16
    # wa_ref: (Dc, H)  bf16   conv_a weight (kernel_size=1 -> matmul)
    # wc_ref: (De, H)  bf16   conv_c weight
    # b_ref : (1, H)   f32    ba + bc pre-summed
    # wl_ref: (H, V)   bf16   linear weight (no bias)
    # out   : (TM, V)         log-probabilities

    # Fused Conv1d(k=1) pair: implicit K = Dc+De via two bf16 matmuls with f32
    # MXU accumulation; bias add in f32.
    h = (jnp.dot(a_ref[...], wa_ref[...], preferred_element_type=jnp.float32)
         + jnp.dot(c_ref[...], wc_ref[...], preferred_element_type=jnp.float32)
         + b_ref[...])                                           # (TM, H) f32

    # LeakyReLU(0.1): max(h, 0.1*h) is identical for slope in (0, 1).
    h = jnp.maximum(h, 0.1 * h)

    # Linear (bias=False): bf16 inputs, f32 accumulation on the MXU.
    p = jnp.dot(h.astype(wl_ref.dtype), wl_ref[...],
                preferred_element_type=jnp.float32)              # (TM, V) f32

    # LogSoftmax over the vocab (lane) dim in f32.
    m = jnp.max(p, axis=-1, keepdims=True)
    s = p - m
    lse = jnp.log(jnp.sum(jnp.exp(s), axis=-1, keepdims=True))
    out_ref[...] = (s - lse).astype(out_ref.dtype)


def _pick_tile_m(M):
    # Big tiles amortize per-step overhead, but keep >=2 grid steps (when M
    # allows) so the 'parallel' row axis can shard across v7x's 2 TensorCores.
    half = (max(M // 2, 1) // 128) * 128
    return max(128, min(512, half))


def prediction_module(a_ncl, c_ncl, wa, ba, wc, bc, wl, *,
                      tile_m=None, out_dtype=jnp.float32):
    """a_ncl: (B, Dc, L), c_ncl: (B, De, L)  (PyTorch NCL layout).
    wa: (Dc, H), ba: (H,), wc: (De, H), bc: (H,), wl: (H, V).
    Returns (B, L, V) log-probabilities (matches the PyTorch output layout)."""
    B, Dc, L = a_ncl.shape
    De = c_ncl.shape[1]
    H = wa.shape[1]
    V = wl.shape[1]

    M = B * L
    tm = _pick_tile_m(M) if tile_m is None else tile_m
    M_pad = pl.cdiv(M, tm) * tm

    # Row-major bf16 activations: transpose + cast fuse into one XLA pass per
    # input; no (M, Dc+De) concat copy (K-concat happens inside the kernel).
    a_rows = jnp.transpose(a_ncl, (0, 2, 1)).reshape(M, Dc).astype(jnp.bfloat16)
    c_rows = jnp.transpose(c_ncl, (0, 2, 1)).reshape(M, De).astype(jnp.bfloat16)
    if M_pad != M:
        a_rows = jnp.pad(a_rows, ((0, M_pad - M), (0, 0)))
        c_rows = jnp.pad(c_rows, ((0, M_pad - M), (0, 0)))

    wa_b = wa.astype(jnp.bfloat16)                               # (Dc, H)
    wc_b = wc.astype(jnp.bfloat16)                               # (De, H)
    b = (ba + bc).reshape(1, H)                                  # (1, H) f32
    wl_b = wl.astype(jnp.bfloat16)                               # (H, V)

    # Per-step VMEM footprint: double-buffered row tiles + output tile, plus the
    # VMEM-resident (constant index_map) weights; clamp to [32 MiB, 64 MiB] so
    # big tiles fit v5e's 16 MiB scoped default without exceeding v7x physical.
    out_bytes = jnp.dtype(out_dtype).itemsize
    est = (2 * (tm * Dc * 2 + tm * De * 2 + tm * V * out_bytes)
           + 2 * (Dc * H * 2 + De * H * 2 + H * 4 + H * V * 2))
    vmem_limit = int(min(64 * 2**20, max(32 * 2**20, 2 * est)))

    grid = (M_pad // tm,)
    out = pl.pallas_call(
        _prediction_kernel,
        out_shape=jax.ShapeDtypeStruct((M_pad, V), out_dtype),
        grid_spec=pltpu.PrefetchScalarGridSpec(
            num_scalar_prefetch=0,
            grid=grid,
            in_specs=[
                pl.BlockSpec((tm, Dc), lambda i: (i, 0)),        # row tile of a
                pl.BlockSpec((tm, De), lambda i: (i, 0)),        # row tile of c
                pl.BlockSpec((Dc, H), lambda i: (0, 0)),         # constant -> VMEM-resident
                pl.BlockSpec((De, H), lambda i: (0, 0)),         # constant -> VMEM-resident
                pl.BlockSpec((1, H), lambda i: (0, 0)),          # constant -> VMEM-resident
                pl.BlockSpec((H, V), lambda i: (0, 0)),          # constant -> VMEM-resident
            ],
            out_specs=pl.BlockSpec((tm, V), lambda i: (i, 0)),   # lane-dense (V % 128 == 0)
        ),
        compiler_params=pltpu.CompilerParams(
            dimension_semantics=("parallel",),                   # row tiles shard across TCs
            vmem_limit_bytes=vmem_limit),
    )(a_rows, c_rows, wa_b, wc_b, b, wl_b)

    return out[:M].reshape(B, L, V)


def _reference_f32(a_ncl, c_ncl, wa, ba, wc, bc, wl):
    # Pure-JAX f32 reference matching the PyTorch forward exactly.
    a = jnp.transpose(a_ncl, (0, 2, 1))
    c = jnp.transpose(c_ncl, (0, 2, 1))
    h = a @ wa + ba[None, None, :] + c @ wc + bc[None, None, :]
    h = jnp.where(h >= 0, h, 0.1 * h)
    p = h @ wl
    return jax.nn.log_softmax(p, axis=2)


if __name__ == "__main__":
    # Small shapes consistent with the module (M = B*L = 256 -> tile_m=128,
    # grid has 2 'parallel' steps so both v7x TensorCores get work).
    B, L = 2, 128          # batch, sequence length
    Dc, De = 32, 32        # image_vectors, embedding_dim
    H, V = 128, 256        # hidden_layer, vocab_size

    key = jax.random.PRNGKey(0)
    k_a, k_c, k_wa, k_ba, k_wc, k_bc, k_wl = jax.random.split(key, 7)

    # Inputs in PyTorch NCL layout.
    a = jax.random.normal(k_a, (B, Dc, L), dtype=jnp.float32)
    c = jax.random.normal(k_c, (B, De, L), dtype=jnp.float32)

    # Deterministic parameters.  Conv weights stored pre-transposed as (Cin, H),
    # linear weight as (H, V) (i.e. transposed PyTorch layouts).
    wa = jax.random.uniform(k_wa, (Dc, H), jnp.float32, -1.0, 1.0) / jnp.sqrt(Dc)
    ba = jax.random.uniform(k_ba, (H,), jnp.float32, -1.0, 1.0) / jnp.sqrt(Dc)
    wc = jax.random.uniform(k_wc, (De, H), jnp.float32, -1.0, 1.0) / jnp.sqrt(De)
    bc = jax.random.uniform(k_bc, (H,), jnp.float32, -1.0, 1.0) / jnp.sqrt(De)
    wl = jax.random.uniform(k_wl, (H, V), jnp.float32, -1.0, 1.0) / jnp.sqrt(H)

    out = prediction_module(a, c, wa, ba, wc, bc, wl)
    out = jax.block_until_ready(out)

    assert out.shape == (B, L, V)
    assert bool(jnp.all(jnp.isfinite(out)))

    # Tolerance covers bf16-input / f32-accumulate matmuls (observed error is
    # ~1e-2 worst case; 5e-2 leaves margin while still catching real bugs).
    ref = _reference_f32(a, c, wa, ba, wc, bc, wl)
    assert jnp.allclose(out, ref, atol=5e-2, rtol=5e-2), "mismatch vs f32 reference"

    print("KERNEL_OK")
</pallas_src>

<mosaic_0001>
module attributes {stable_mosaic.version = 11 : i64} {
  func.func @_prediction_kernel(%arg0: i32, %arg1: memref<128x32xbf16, #tpu.memory_space<vmem>>, %arg2: memref<128x32xbf16, #tpu.memory_space<vmem>>, %arg3: memref<32x128xbf16, #tpu.memory_space<vmem>>, %arg4: memref<32x128xbf16, #tpu.memory_space<vmem>>, %arg5: memref<1x128xf32, #tpu.memory_space<vmem>>, %arg6: memref<128x256xbf16, #tpu.memory_space<vmem>>, %arg7: memref<128x256xf32, #tpu.memory_space<vmem>>) attributes {dimension_semantics = [#tpu.dimension_semantics<parallel>], iteration_bounds = array<i64: 2>, scalar_prefetch = 0 : i64, scratch_operands = 0 : i64, tpu.core_type = #tpu.core_type<tc>, window_params = [{transform_indices = @transform_0, window_bounds = array<i64: 128, 32>}, {transform_indices = @transform_1, window_bounds = array<i64: 128, 32>}, {pipeline_mode = #tpu.pipeline_mode<synchronous>, transform_indices = @transform_2, window_bounds = array<i64: 32, 128>}, {pipeline_mode = #tpu.pipeline_mode<synchronous>, transform_indices = @transform_3, window_bounds = array<i64: 32, 128>}, {pipeline_mode = #tpu.pipeline_mode<synchronous>, transform_indices = @transform_4, window_bounds = array<i64: 1, 128>}, {pipeline_mode = #tpu.pipeline_mode<synchronous>, transform_indices = @transform_5, window_bounds = array<i64: 128, 256>}, {transform_indices = @transform_6, window_bounds = array<i64: 128, 256>}]} {
    %c0 = arith.constant 0 : index
    %c0_0 = arith.constant 0 : index
    %0 = vector.load %arg1[%c0, %c0_0] : memref<128x32xbf16, #tpu.memory_space<vmem>>, vector<128x32xbf16>
    %c0_1 = arith.constant 0 : index
    %c0_2 = arith.constant 0 : index
    %1 = vector.load %arg3[%c0_1, %c0_2] : memref<32x128xbf16, #tpu.memory_space<vmem>>, vector<32x128xbf16>
    %cst = arith.constant dense<0.000000e+00> : vector<128x128xf32>
    %2 = tpu.matmul %0, %1, %cst {dimension_numbers = #tpu.dot_dimension_numbers<[1], [0], [0], [1], [0, 0, 1, 1], [], []>} : vector<128x32xbf16>, vector<32x128xbf16>, vector<128x128xf32> -> vector<128x128xf32>
    %c0_3 = arith.constant 0 : index
    %c0_4 = arith.constant 0 : index
    %3 = vector.load %arg2[%c0_3, %c0_4] : memref<128x32xbf16, #tpu.memory_space<vmem>>, vector<128x32xbf16>
    %c0_5 = arith.constant 0 : index
    %c0_6 = arith.constant 0 : index
    %4 = vector.load %arg4[%c0_5, %c0_6] : memref<32x128xbf16, #tpu.memory_space<vmem>>, vector<32x128xbf16>
    %cst_7 = arith.constant dense<0.000000e+00> : vector<128x128xf32>
    %5 = tpu.matmul %3, %4, %cst_7 {dimension_numbers = #tpu.dot_dimension_numbers<[1], [0], [0], [1], [0, 0, 1, 1], [], []>} : vector<128x32xbf16>, vector<32x128xbf16>, vector<128x128xf32> -> vector<128x128xf32>
    %6 = arith.addf %2, %5 : vector<128x128xf32>
    %c0_8 = arith.constant 0 : index
    %c0_9 = arith.constant 0 : index
    %7 = vector.load %arg5[%c0_8, %c0_9] : memref<1x128xf32, #tpu.memory_space<vmem>>, vector<1x128xf32>
    %8 = vector.broadcast %7 : vector<1x128xf32> to vector<128x128xf32>
    %9 = arith.addf %6, %8 : vector<128x128xf32>
    %cst_10 = arith.constant 1.000000e-01 : f32
    %10 = vector.broadcast %cst_10 : f32 to vector<128x128xf32>
    %11 = arith.mulf %10, %9 : vector<128x128xf32>
    %12 = arith.maximumf %9, %11 : vector<128x128xf32>
    %13 = arith.truncf %12 : vector<128x128xf32> to vector<128x128xbf16>
    %c0_11 = arith.constant 0 : index
    %c0_12 = arith.constant 0 : index
    %14 = vector.load %arg6[%c0_11, %c0_12] : memref<128x256xbf16, #tpu.memory_space<vmem>>, vector<128x256xbf16>
    %cst_13 = arith.constant dense<0.000000e+00> : vector<128x256xf32>
    %15 = tpu.matmul %13, %14, %cst_13 {dimension_numbers = #tpu.dot_dimension_numbers<[1], [0], [0], [1], [0, 0, 1, 1], [], []>} : vector<128x128xbf16>, vector<128x256xbf16>, vector<128x256xf32> -> vector<128x256xf32>
    %cst_14 = arith.constant dense<0xFF800000> : vector<128xf32>
    %16 = vector.multi_reduction <maximumf>, %15, %cst_14 [1] : vector<128x256xf32> to vector<128xf32>
    %17 = vector.shape_cast %16 : vector<128xf32> to vector<128x1xf32>
    %18 = vector.broadcast %17 : vector<128x1xf32> to vector<128x256xf32>
    %19 = arith.subf %15, %18 : vector<128x256xf32>
    %20 = math.exp %19 : vector<128x256xf32>
    %cst_15 = arith.constant dense<0.000000e+00> : vector<128xf32>
    %21 = vector.multi_reduction <add>, %20, %cst_15 [1] : vector<128x256xf32> to vector<128xf32>
    %22 = vector.shape_cast %21 : vector<128xf32> to vector<128x1xf32>
    %23 = math.log %22 : vector<128x1xf32>
    %24 = vector.broadcast %23 : vector<128x1xf32> to vector<128x256xf32>
    %25 = arith.subf %19, %24 : vector<128x256xf32>
    %c0_16 = arith.constant 0 : index
    %c0_17 = arith.constant 0 : index
    %26 = vector.load %arg7[%c0_16, %c0_17] : memref<128x256xf32, #tpu.memory_space<vmem>>, vector<128x256xf32>
    tpu.vector_store %arg7[%c0_16, %c0_17], %25 {strides = array<i32>} : memref<128x256xf32, #tpu.memory_space<vmem>>, vector<128x256xf32>,
    return
  }
  func.func @transform_0(%arg0: i32) -> (i32, i32) {
    %c0_i32 = arith.constant 0 : i32
    %c0_i32_0 = arith.constant 0 : i32
    return %arg0, %c0_i32 : i32, i32
  }
  func.func @transform_1(%arg0: i32) -> (i32, i32) {
    %c0_i32 = arith.constant 0 : i32
    %c0_i32_0 = arith.constant 0 : i32
    return %arg0, %c0_i32 : i32, i32
  }
  func.func @transform_2(%arg0: i32) -> (i32, i32) {
    %c0_i32 = arith.constant 0 : i32
    %c0_i32_0 = arith.constant 0 : i32
    %c0_i32_1 = arith.constant 0 : i32
    return %c0_i32, %c0_i32_0 : i32, i32
  }
  func.func @transform_3(%arg0: i32) -> (i32, i32) {
    %c0_i32 = arith.constant 0 : i32
    %c0_i32_0 = arith.constant 0 : i32
    %c0_i32_1 = arith.constant 0 : i32
    return %c0_i32, %c0_i32_0 : i32, i32
  }
  func.func @transform_4(%arg0: i32) -> (i32, i32) {
    %c0_i32 = arith.constant 0 : i32
    %c0_i32_0 = arith.constant 0 : i32
    %c0_i32_1 = arith.constant 0 : i32
    return %c0_i32, %c0_i32_0 : i32, i32
  }
  func.func @transform_5(%arg0: i32) -> (i32, i32) {
    %c0_i32 = arith.constant 0 : i32
    %c0_i32_0 = arith.constant 0 : i32
    %c0_i32_1 = arith.constant 0 : i32
    return %c0_i32, %c0_i32_0 : i32, i32
  }
  func.func @transform_6(%arg0: i32) -> (i32, i32) {
    %c0_i32 = arith.constant 0 : i32
    %c0_i32_0 = arith.constant 0 : i32
    return %arg0, %c0_i32 : i32, i32
  }
}

</mosaic_0001>

<bundles_post_ra>
// kernel: tpu_custom_call.1
= control target key start
LH: loop header
LB: loop body
LE: loop exit
PB: predicated region body
PF: predicated region fallthrough
CT: control target
= control target key end

     0   :  { %11 = vsyncpa [#allocation3], 0  ;;  %s2265_s0 = inlined_call_operand.vmem [shape: bf16[256,32], index: 0, kind: input, shape index: {}]   ;;  %s2266_s1 = inlined_call_operand.vmem [shape: bf16[256,32], index: 1, kind: input, shape index: {}]   ;;  %s2267_s2 = inlined_call_operand.vmem [shape: bf16[32,128], index: 2, kind: input, shape index: {}]   ;;  %s2268_s3 = inlined_call_operand.vmem [shape: bf16[32,128], index: 3, kind: input, shape index: {}]   ;;  %s2269_s4 = inlined_call_operand.vmem [shape: f32[1,128], index: 4, kind: input, shape index: {}]   ;;  %s2270_s5 = inlined_call_operand.vmem [shape: bf16[128,256], index: 5, kind: input, shape index: {}]   ;;  %s2271_s6 = inlined_call_operand.hbm [shape: f32[256,256], index: 6, kind: output, shape index: {}]  }
   0x1   :  { %13 = vsyncpa [#allocation3 + $0x1], 0  ;;  %s1741_s21 = smov 0   ;;  %s1743_s22 = smov 0  }
   0x2   :  { %s1745_s23 = smov 0   ;;  %s1747_s24 = smov 0  }
   0x3 LB: > { %s1762_s25 = sadd.s32 4294967295, %s1700_s24   ;;  %s1312_s26 = sadd.s32 4294967294, %s1700_s24   ;;  %s1700_s24 = sphi %s1747_s24, %s2277_s24   ;;  %s1696_s23 = sphi %s1745_s23, %s2276_s23   ;;  %s1692_s22 = sphi %s1743_s22, %s2275_s22   ;;  %s1688_s21 = sphi %s1741_s21, %s2274_s21  }
   0x4   : > { %s1766_s27 = sadd.s32 1, %s1700_s24   ;;  %s162_s28 = sadd.s32 1, %s1696_s23 }
   0x5   : > { %s159_s29 = ssub.s32 %s1700_s24, %s1766_s27  ;;  %p172_p0 = scmp.ne.s32.totalorder %s1696_s23, %s1692_s22 }
   0x6   : > { %p160_p1 = scmp.eq.s32.totalorder %s159_s29, 0  ;;  %p173_p2 = scmp.eq.s32.totalorder %s1762_s25, 1 }
   0x7   : > { %p178_p3 = scmp.ne.s32.totalorder %s1692_s22, %s1688_s21  ;;  %p179_p4 = scmp.eq.s32.totalorder %s1312_s26, 1 }
   0x8   : > { %s1777_s30 = scalar_select %p160_p1, %s1696_s23, %s162_s28  }
   0x9   : > { %p1779_p5 = por %p173_p2, %p172_p0  ;;  %p1783_p6 = por %p179_p4, %p178_p3 }
   0xa   : > { %p1315_p7 = scmp.ge.s32.totalorder %s1700_s24, 1  ;;  %p227_p8 = scmp.lt.s32.totalorder %s1700_s24, 3 }
   0xc   : > { %p228_p9 = pnand %p1315_p7, %p227_p8 }
   0xd   : > { %s1317_s11 = sshll.u32 (!%p228_p9), %s1762_s25, 4  ;;  %s259_s16 = sand.u32 (!%p228_p9), 1, %s1692_s22  }
   0xe   : > { %231 = sbr.rel (%p228_p9) target bundleno = 808 (0x328), region = 44  ;;  %p263_p10 = scmp.lt.s32.totalorder (!%p228_p9), %s1317_s11, 31 }
   0xf   : > { %s1316_s17 = sshll.u32 (!%p228_p9), %s259_s16, 8  ;;  %s1703_s9 = smov (!%p228_p9), [#allocation2]  }
  0x10   : > { %s1644_s10 = sshll.u32 (!%p228_p9), %s1703_s9, 4  ;;  %s1645_s10 = int_to_ptr.vmem [resolvable:$false] %s1644_s10 }
  0x11   : > { %s1646_s13 = scalar_lea.vmem (!%p228_p9), %s1645_s10, 8192 }
  0x13   : > { %v1500_v0 = vld [vmem:[%s2268_s3 + $0x8] sm:$0xff]   ;;  %v1502_v2 = vld [vmem:[%s2268_s3] sm:$0xff]   ;;  %s2279_s11 = smov (!%p263_p10, %s1317_s11), 31  ;;  %v1522_v4 = vld [vmem:[%s2270_s5 + $0x74] ss:$8 sps:$4 sm:$0xff]   ;;  %vm368_vm0 = vcmask 261120  }
  0x14   : > { %v1501_v1 = vld [vmem:[%s2267_s2 + $0x8] sm:$0xff]   ;;  %1402 = vmatprep.subr.bf16.mxu0 %v1500_v0  ;;  %v1503_v3 = vld [vmem:[%s2267_s2] sm:$0xff]   ;;  %s1318_s18 = sshll.u32 %s2279_s11, 2  ;;  %v1520_v5 = vld [vmem:[%s2270_s5 + $0x70] ss:$8 sps:$4 sm:$0xff]   ;;  %v1702_v36 = vmov 0  }
  0x15   : > { %1422 = vmatprep.subr.bf16.mxu1 %v1501_v1  ;;  %1403 = vmatpush3.bf16.msra.mxu0 %v1500_v0  ;;  %s1808_s29 = scalar_lea.vmem %s2266_s1, %s1318_s18  ;;  %s1813_s12 = scalar_lea.vmem %s2265_s0, %s1318_s18  ;;  %v1525_v7 = vld [vmem:[%s2270_s5 + $0x64] ss:$8 sps:$4 sm:$0xff]   ;;  %v1523_v11 = vld [vmem:[%s2270_s5 + $0x60] ss:$8 sps:$4 sm:$0xff]   ;;  %v1526_v22 = vld [vmem:[%s2270_s5 + $0x50] ss:$8 sps:$4 sm:$0xff]  }
  0x16   : > { %1423 = vmatpush3.bf16.msra.mxu1 %v1501_v1  ;;  %1404 = vmatprep.subr.bf16.mxu0 %v1502_v2  ;;  %v1504_v6 = vld [vmem:[%s1808_s29] sm:$0xff]   ;;  %v1506_v9 = vld [vmem:[%s1808_s29 + $0x8] sm:$0xff]   ;;  %v1508_v12 = vld [vmem:[%s1808_s29 + $0x10] sm:$0xff]   ;;  %s2150_s18 = scalar_lea.vmem [#allocation2], %s1316_s17 }
  0x17   : > { %1424 = vmatprep.subr.bf16.mxu1 %v1503_v3  ;;  %v1505_v8 = vld [vmem:[%s1813_s12] sm:$0xff]   ;;  %1406 = vmatprep.mubr.msk.bf16.mxu0 %vm368_vm0, %v1504_v6  ;;  %v1507_v10 = vld [vmem:[%s1813_s12 + $0x8] sm:$0xff]   ;;  %v1509_v13 = vld [vmem:[%s1813_s12 + $0x10] sm:$0xff]  }
  0x18   : > { %1426 = vmatprep.mubr.msk.bf16.mxu1 %vm368_vm0, %v1505_v8  ;;  %v1510_v14 = vld [vmem:[%s1808_s29 + $0x18] sm:$0xff]   ;;  %v1512_v16 = vld [vmem:[%s1808_s29 + $0x20] sm:$0xff]   ;;  %v1514_v18 = vld [vmem:[%s1808_s29 + $0x28] sm:$0xff]  }
  0x19   : > { %1405 = vmatpush3.bf16.msra.mxu0 %v1502_v2  ;;  %v1511_v15 = vld [vmem:[%s1813_s12 + $0x18] sm:$0xff]   ;;  %v1513_v17 = vld [vmem:[%s1813_s12 + $0x20] sm:$0xff]   ;;  %v1515_v19 = vld [vmem:[%s1813_s12 + $0x28] sm:$0xff]  }
  0x1a   : > { %1425 = vmatpush3.bf16.msra.mxu1 %v1503_v3  ;;  %822 = vmatprep.subr.bf16.mxu0 %v1522_v4  ;;  %v1516_v20 = vld [vmem:[%s1808_s29 + $0x30] sm:$0xff]   ;;  %v1529_v24 = vld [vmem:[%s2270_s5 + $0x40] ss:$8 sps:$4 sm:$0xff]   ;;  %v1531_v25 = vld [vmem:[%s2270_s5 + $0x44] ss:$8 sps:$4 sm:$0xff]  }
  0x1b   : > { %1442 = vmatprep.subr.bf16.mxu1 %v1522_v4  ;;  %v1517_v21 = vld [vmem:[%s1813_s12 + $0x30] sm:$0xff]   ;;  %v1518_v26 = vld [vmem:[%s1808_s29 + $0x38] sm:$0xff]   ;;  %v1537_v30 = vld [vmem:[%s2270_s5 + $0x24] ss:$8 sps:$4 sm:$0xff]   ;;  %s1381_s29 = sshll.u32 %s1762_s25, 12  ;;  %s2225_s25 = scalar_lea.sflag [#allocation3], %s259_s16 }
  0x1c   : > { %1407 = vmatmul.mubr.msk.bf16.vlgmr.msra.gmra.mxu0 %vm368_vm0, %v1506_v9  ;;  %v1528_v23 = vld [vmem:[%s2270_s5 + $0x54] ss:$8 sps:$4 sm:$0xff]   ;;  %v1532_v29 = vld [vmem:[%s2270_s5 + $0x30] ss:$8 sps:$4 sm:$0xff]   ;;  %v1535_v31 = vld [vmem:[%s2270_s5 + $0x20] ss:$8 sps:$4 sm:$0xff]   ;;  %s2215_s26 = scalar_lea.hbm %s2271_s6, %s1381_s29 }
  0x1d   : > { %1427 = vmatmul.mubr.msk.bf16.vlgmr.msra.gmra.mxu1 %vm368_vm0, %v1507_v10  ;;  %823 = vmatpush1.bf16.msra.mxu0 %v1520_v5  ;;  %v1519_v27 = vld [vmem:[%s1813_s12 + $0x38] sm:$0xff]   ;;  %v1543_v34 = vld [vmem:[%s2270_s5 + $0x4] ss:$8 sps:$4 sm:$0xff]   ;;  %v1541_v35 = vld [vmem:[%s2270_s5] ss:$8 sps:$4 sm:$0xff]   ;;  %s1238_s12 = sshll.u32 %s2150_s18, 4  ;;  %s2217_s12 = int_to_ptr.vmem [resolvable:$true] %s1238_s12 }
  0x1e   : > { %1410 = vmatprep.mubr.msk.bf16.mxu0 %vm368_vm0, %v1508_v12  ;;  %824 = vmatprep.subr.bf16.mxu0 %v1525_v7  ;;  %v1534_v28 = vld [vmem:[%s2270_s5 + $0x34] ss:$8 sps:$4 sm:$0xff]   ;;  %v1538_v33 = vld [vmem:[%s2270_s5 + $0x10] ss:$8 sps:$4 sm:$0xff]   ;;  %v1897_v43 = vld [vmem:[%s2269_s4] ss:$0 sm:$0xff]  ;;  %p1647_p0 = scmp.lt.s32.totalorder %s2217_s12, %s1645_s10 }
  0x1f   : > { %1430 = vmatprep.mubr.msk.bf16.mxu1 %vm368_vm0, %v1509_v13  ;;  %1450 = vmatpush1.bf16.msra.mxu1 %v1520_v5  ;;  %v1540_v32 = vld [vmem:[%s2270_s5 + $0x14] ss:$8 sps:$4 sm:$0xff]   ;;  %s1640_s28 = scalar_lea.vmem %s2217_s12, 4096 }
  0x20   : > { %1443 = vmatprep.subr.bf16.mxu1 %v1525_v7  ;;  %p1641_p11 = scmp.ne.s32.totalorder %s2217_s12, %s1640_s28  ;;  %p1648_p1 = scmp.lt.s32.totalorder %s1646_s13, %s1640_s28 }
  0x21   : > { %825 = vmatpush1.bf16.msra.mxu0 %v1523_v11 }
  0x22   : > { %826 = vmatprep.subr.bf16.mxu0 %v1528_v23  ;;  %p1642_p12 = pnand %p1641_p11, %p1779_p5  ;;  %p1649_p2 = por %p1648_p1, %p1647_p0 }
  0x23   : > { %1451 = vmatpush1.bf16.msra.mxu1 %v1523_v11 }
  0x24   : > { %1411 = vmatmul.mubr.msk.bf16.gmra.mxu0 %vm368_vm0, %v1510_v14  ;;  %1444 = vmatprep.subr.bf16.mxu1 %v1528_v23  ;;  %p1643_p13 = pneg %p1642_p12 }
  0x25   : > { %1431 = vmatmul.mubr.msk.bf16.gmra.mxu1 %vm368_vm0, %v1511_v15  ;;  %1414 = vmatprep.mubr.msk.bf16.mxu0 %vm368_vm0, %v1512_v16 }
  0x26   : > { %1434 = vmatprep.mubr.msk.bf16.mxu1 %vm368_vm0, %v1513_v17  ;;  %827 = vmatpush1.bf16.msra.mxu0 %v1526_v22  ;;  %p1650_p3 = pnand %p1649_p2, %p1643_p13 }
  0x27   : > { %1452 = vmatpush1.bf16.msra.mxu1 %v1526_v22  ;;  %828 = vmatprep.subr.bf16.mxu0 %v1531_v25 }
  0x28   : > { %1445 = vmatprep.subr.bf16.mxu1 %v1531_v25 }
  0x2a   : > { %829 = vmatpush1.bf16.msra.mxu0 %v1529_v24 }
  0x2b   : > { %1453 = vmatpush1.bf16.msra.mxu1 %v1529_v24  ;;  %830 = vmatprep.subr.bf16.mxu0 %v1534_v28 }
  0x2c   : > { %1415 = vmatmul.mubr.msk.bf16.gmra.mxu0 %vm368_vm0, %v1514_v18  ;;  %1446 = vmatprep.subr.bf16.mxu1 %v1534_v28 }
  0x2d   : > { %1435 = vmatmul.mubr.msk.bf16.gmra.mxu1 %vm368_vm0, %v1515_v19  ;;  %1418 = vmatprep.mubr.msk.bf16.mxu0 %vm368_vm0, %v1516_v20 }
  0x2e   : > { %1438 = vmatprep.mubr.msk.bf16.mxu1 %vm368_vm0, %v1517_v21  ;;  %831 = vmatpush1.bf16.msra.mxu0 %v1532_v29 }
  0x2f   : > { %1454 = vmatpush1.bf16.msra.mxu1 %v1532_v29  ;;  %832 = vmatprep.subr.bf16.mxu0 %v1537_v30 }
  0x30   : > { %1447 = vmatprep.subr.bf16.mxu1 %v1537_v30 }
  0x32   : > { %833 = vmatpush1.bf16.msra.mxu0 %v1535_v31 }
  0x33   : > { %1455 = vmatpush1.bf16.msra.mxu1 %v1535_v31  ;;  %834 = vmatprep.subr.bf16.mxu0 %v1540_v32 }
  0x34   : > { %1419 = vmatmul.mubr.msk.bf16.gmra.mxu0 %vm368_vm0, %v1518_v26  ;;  %1448 = vmatprep.subr.bf16.mxu1 %v1540_v32 }
  0x35   : > { %1439 = vmatmul.mubr.msk.bf16.gmra.mxu1 %vm368_vm0, %v1519_v27  ;;  %854 = vmatprep.mubr.bf16.mxu0 %v1702_v36 }
  0x36   : > { %835 = vmatpush1.bf16.msra.mxu0 %v1538_v33  ;;  %894 = vmatprep.mubr.bf16.mxu1 %v1702_v36 }
  0x37   : > { %1456 = vmatpush1.bf16.msra.mxu1 %v1538_v33  ;;  %836 = vmatprep.subr.bf16.mxu0 %v1543_v34 }
  0x38   : > { %1449 = vmatprep.subr.bf16.mxu1 %v1543_v34 }
  0x3a   : > { %837 = vmatpush1.bf16.msra.mxu0 %v1541_v35 }
  0x3b   : > { %1457 = vmatpush1.bf16.msra.mxu1 %v1541_v35 }
  0xdc   : > { %v1408_v37 = vpop.f32.mrf.mxu0 }
  0xdd   : > { %v1428_v38 = vpop.f32.mrf.mxu1 }
  0xde   : > { %v427_v39 = vpop.f32.mrf.mxu0  ;;  %v609_v52 = vadd.f32 %v1428_v38, %v1408_v37 }
  0xdf   : > { %v600_v40 = vpop.f32.mrf.mxu1 }
  0xe0   : > { %v601_v41 = vadd.f32 %v600_v40, %v427_v39  ;;  %v1409_v42 = vpop.f32.mrf.mxu0  ;;  %v672_v61 = vadd.f32 %v1897_v43, %v609_v52 }
  0xe1   : > { %v1429_v44 = vpop.f32.mrf.mxu1 }
  0xe2   : > { %v670_v45 = vadd.f32 %v1897_v43, %v601_v41  ;;  %v430_v46 = vpop.f32.mrf.mxu0  ;;  %v612_v48 = vadd.f32 %v1429_v44, %v1409_v42  ;;  %v688_v7 = vmul.f32 0.1, %v672_v61 }
  0xe3   : > { %v603_v47 = vpop.f32.mrf.mxu1 }
  0xe4   : > { %v604_v49 = vadd.f32 %v603_v47, %v430_v46  ;;  %v1412_v50 = vpop.f32.mrf.mxu0  ;;  %v686_v53 = vmul.f32 0.1, %v670_v45  ;;  %v673_v57 = vadd.f32 %v1897_v43, %v612_v48  ;;  %v704_v16 = vmax.f32 %v672_v61, %v688_v7 }
  0xe5   : > { %v1432_v51 = vpop.f32.mrf.mxu1 }
  0xe6   : > { %v671_v54 = vadd.f32 %v1897_v43, %v604_v49  ;;  %v443_v55 = vpop.f32.mrf.mxu0  ;;  %v702_v62 = vmax.f32 %v670_v45, %v686_v53  ;;  %v689_v2 = vmul.f32 0.1, %v673_v57  ;;  %v625_v27 = vadd.f32 %v1432_v51, %v1412_v50 }
  0xe7   : > { %v616_v56 = vpop.f32.mrf.mxu1 }
  0xe8   : > { %v687_v58 = vmul.f32 0.1, %v671_v54  ;;  %v1413_v59 = vpop.f32.mrf.mxu0  ;;  %v617_v8 = vadd.f32 %v616_v56, %v443_v55  ;;  %v705_v11 = vmax.f32 %v673_v57, %v689_v2  ;;  %v676_v41 = vadd.f32 %v1897_v43, %v625_v27 }
  0xe9   : > { %v1433_v60 = vpop.f32.mrf.mxu1 }
  0xea   : > { %v703_v63 = vmax.f32 %v671_v54, %v687_v58  ;;  %v446_v0 = vpop.f32.mrf.mxu0  ;;  %v674_v17 = vadd.f32 %v1897_v43, %v617_v8  ;;  %v628_v20 = vadd.f32 %v1433_v60, %v1413_v59  ;;  %v719_v26 = vpack.c.bf16 %v705_v11, %v704_v16 }
  0xeb   : > { %v619_v1 = vpop.f32.mrf.mxu1  ;;  %v692_v55 = vmul.f32 0.1, %v676_v41 }
  0xec   : > { %v718_v3 = vpack.c.bf16 %v703_v63, %v702_v62  ;;  %v1416_v4 = vpop.f32.mrf.mxu0  ;;  %v620_v5 = vadd.f32 %v619_v1, %v446_v0  ;;  %v690_v29 = vmul.f32 0.1, %v674_v17  ;;  %v677_v34 = vadd.f32 %v1897_v43, %v628_v20 }
  0xed   : > { %v1436_v6 = vpop.f32.mrf.mxu1  ;;  %v708_v62 = vmax.f32 %v676_v41, %v692_v55 }
  0xee   : > { %855 = vmatmul.mubr.bf16.vlgmr.msra.gmra.mxu0 %v718_v3  ;;  %v459_v9 = vpop.f32.mrf.mxu0  ;;  %v675_v12 = vadd.f32 %v1897_v43, %v620_v5  ;;  %v641_v30 = vadd.f32 %v1436_v6, %v1416_v4  ;;  %v706_v44 = vmax.f32 %v674_v17, %v690_v29  ;;  %v693_v49 = vmul.f32 0.1, %v677_v34 }
  0xef   : > { %v632_v10 = vpop.f32.mrf.mxu1  ;;  %864 = vmatprep.mubr.bf16.mxu0 %v1702_v36 }
  0xf0   : > { %v633_v13 = vadd.f32 %v632_v10, %v459_v9  ;;  %v1417_v14 = vpop.f32.mrf.mxu0  ;;  %v691_v22 = vmul.f32 0.1, %v675_v12  ;;  %v680_v45 = vadd.f32 %v1897_v43, %v641_v30  ;;  %v709_v58 = vmax.f32 %v677_v34, %v693_v49 }
  0xf1   : > { %v1437_v15 = vpop.f32.mrf.mxu1 }
  0xf2   : > { %v678_v18 = vadd.f32 %v1897_v43, %v633_v13  ;;  %v462_v19 = vpop.f32.mrf.mxu0  ;;  %v644_v23 = vadd.f32 %v1437_v15, %v1417_v14  ;;  %v707_v37 = vmax.f32 %v675_v12, %v691_v22  ;;  %v696_v57 = vmul.f32 0.1, %v680_v45 }
  0xf3   : > { %v635_v21 = vpop.f32.mrf.mxu1  ;;  %v721_v1 = vpack.c.bf16 %v709_v58, %v708_v62 }
  0xf4   : > { %v636_v24 = vadd.f32 %v635_v21, %v462_v19  ;;  %v1420_v25 = vpop.f32.mrf.mxu0  ;;  %v694_v31 = vmul.f32 0.1, %v678_v18  ;;  %v681_v38 = vadd.f32 %v1897_v43, %v644_v23  ;;  %v720_v54 = vpack.c.bf16 %v707_v37, %v706_v44 }
  0xf5   : > { %v1440_v28 = vpop.f32.mrf.mxu1  ;;  %v712_v63 = vmax.f32 %v680_v45, %v696_v57 }
  0xf6   : > { %v679_v32 = vadd.f32 %v1897_v43, %v636_v24  ;;  %865 = vmatmul.mubr.bf16.gmra.mxu0 %v719_v26  ;;  %v475_v33 = vpop.f32.mrf.mxu0  ;;  %v710_v46 = vmax.f32 %v678_v18, %v694_v31  ;;  %v697_v51 = vmul.f32 0.1, %v681_v38  ;;  %v657_v0 = vadd.f32 %v1440_v28, %v1420_v25 }
  0xf7   : > { %v648_v35 = vpop.f32.mrf.mxu1  ;;  %874 = vmatprep.mubr.bf16.mxu0 %v1702_v36 }
  0xf8   : > { %v695_v39 = vmul.f32 0.1, %v679_v32  ;;  %v1421_v40 = vpop.f32.mrf.mxu0  ;;  %v649_v53 = vadd.f32 %v648_v35, %v475_v33  ;;  %v713_v59 = vmax.f32 %v681_v38, %v697_v51  ;;  %v684_v6 = vadd.f32 %v1897_v43, %v657_v0 }
  0xf9   : > { %v1441_v42 = vpop.f32.mrf.mxu1 }
  0xfa   : > { %v711_v47 = vmax.f32 %v679_v32, %v695_v39  ;;  %v478_v48 = vpop.f32.mrf.mxu0  ;;  %v682_v60 = vadd.f32 %v1897_v43, %v649_v53  ;;  %v660_v3 = vadd.f32 %v1441_v42, %v1421_v40  ;;  %v723_v5 = vpack.c.bf16 %v713_v59, %v712_v63 }
  0xfb   : > { %v651_v50 = vpop.f32.mrf.mxu1  ;;  %v700_v10 = vmul.f32 0.1, %v684_v6 }
  0xfc   : > { %v722_v52 = vpack.c.bf16 %v711_v47, %v710_v46  ;;  %v652_v56 = vadd.f32 %v651_v50, %v478_v48  ;;  %v698_v2 = vmul.f32 0.1, %v682_v60  ;;  %v685_v8 = vadd.f32 %v1897_v43, %v660_v3 }
  0xfd   : > { %v716_v13 = vmax.f32 %v684_v6, %v700_v10 }
  0xfe   : > { %875 = vmatmul.mubr.bf16.gmra.mxu0 %v720_v54  ;;  %895 = vmatmul.mubr.bf16.vlgmr.msra.gmra.mxu1 %v722_v52  ;;  %v683_v61 = vadd.f32 %v1897_v43, %v652_v56  ;;  %v714_v7 = vmax.f32 %v682_v60, %v698_v2  ;;  %v701_v11 = vmul.f32 0.1, %v685_v8 }
  0xff   : > { %884 = vmatprep.mubr.bf16.mxu0 %v1702_v36  ;;  %904 = vmatprep.mubr.bf16.mxu1 %v1702_v36 }
 0x100   : > { %v699_v4 = vmul.f32 0.1, %v683_v61  ;;  %v717_v14 = vmax.f32 %v685_v8, %v701_v11 }
 0x102   : > { %v715_v9 = vmax.f32 %v683_v61, %v699_v4  ;;  %v725_v15 = vpack.c.bf16 %v717_v14, %v716_v13 }
 0x104   : > { %v724_v12 = vpack.c.bf16 %v715_v9, %v714_v7 }
 0x106   : > { %885 = vmatmul.mubr.bf16.gmra.mxu0 %v721_v1  ;;  %905 = vmatmul.mubr.bf16.gmra.mxu1 %v723_v5 }
 0x107   : > { %914 = vmatprep.mubr.bf16.mxu1 %v1702_v36 }
 0x10e   : > { %915 = vmatmul.mubr.bf16.gmra.mxu1 %v724_v12 }
 0x10f   : > { %924 = vmatprep.mubr.bf16.mxu1 %v1702_v36 }
 0x116   : > { %925 = vmatmul.mubr.bf16.gmra.mxu1 %v725_v15 }
 0x1ae   : > { %v1921_v16 = vpop.f32.mrf.mxu0 }
 0x1b0   : > { %v1923_v17 = vpop.f32.mrf.mxu0 }
 0x1b1   : > { %v935_v18 = vmax.f32 %v1921_v16, %v1923_v17 }
 0x1b2   : > { %v1927_v19 = vpop.f32.mrf.mxu0 }
 0x1b3   : > { %936 = vmax.xlane.f32.xlu0 %v935_v18 }
 0x1b4   : > { %v1929_v43 = vpop.f32.mrf.mxu0 }
 0x1b5   : > { %v938_v20 = vmax.f32 %v1927_v19, %v1929_v43 }
 0x1b6   : > { %v1933_v36 = vpop.f32.mrf.mxu0 }
 0x1b7   : > { %939 = vmax.xlane.f32.xlu0 %v938_v20 }
 0x1b8   : > { %v1935_v21 = vpop.f32.mrf.mxu0 }
 0x1b9   : > { %v941_v22 = vmax.f32 %v1933_v36, %v1935_v21 }
 0x1ba   : > { %v1939_v23 = vpop.f32.mrf.mxu0 }
 0x1bb   : > { %942 = vmax.xlane.f32.xlu1 %v941_v22 }
 0x1bc   : > { %v1941_v24 = vpop.f32.mrf.mxu0 }
 0x1bd   : > { %v944_v25 = vmax.f32 %v1939_v23, %v1941_v24 }
 0x1be   : > { %v1945_v26 = vpop.f32.mrf.mxu0  ;;  %v1947_v27 = vpop.f32.mrf.mxu1 }
 0x1bf   : > { %945 = vmax.xlane.f32.xlu1 %v944_v25 }
 0x1c0   : > { %v1949_v28 = vpop.f32.mrf.mxu0  ;;  %v1951_v29 = vpop.f32.mrf.mxu1 }
 0x1c1   : > { %v947_v30 = vmax.f32 %v1945_v26, %v1949_v28  ;;  %v959_v35 = vmax.f32 %v1947_v27, %v1951_v29 }
 0x1c2   : > { %v1955_v31 = vpop.f32.mrf.mxu0  ;;  %v1957_v32 = vpop.f32.mrf.mxu1 }
 0x1c3   : > { %948 = vmax.xlane.f32.xlu0 %v947_v30 }
 0x1c4   : > { %v1959_v33 = vpop.f32.mrf.mxu0  ;;  %v1961_v34 = vpop.f32.mrf.mxu1 }
 0x1c5   : > { %v950_v37 = vmax.f32 %v1955_v31, %v1959_v33  ;;  %v962_v42 = vmax.f32 %v1957_v32, %v1961_v34 }
 0x1c6   : > { %v1967_v38 = vpop.f32.mrf.mxu0  ;;  %v1969_v39 = vpop.f32.mrf.mxu1 }
 0x1c7   : > { %960 = vmax.xlane.f32.xlu0 %v959_v35  ;;  %951 = vmax.xlane.f32.xlu1 %v950_v37 }
 0x1c8   : > { %v1971_v40 = vpop.f32.mrf.mxu0  ;;  %v1973_v41 = vpop.f32.mrf.mxu1 }
 0x1c9   : > { %v953_v44 = vmax.f32 %v1967_v38, %v1971_v40  ;;  %v965_v50 = vmax.f32 %v1969_v39, %v1973_v41 }
 0x1ca   : > { %v1979_v45 = vpop.f32.mrf.mxu0  ;;  %v1981_v46 = vpop.f32.mrf.mxu1 }
 0x1cb   : > { %963 = vmax.xlane.f32.xlu1 %v962_v42  ;;  %954 = vmax.xlane.f32.xlu0 %v953_v44 }
 0x1cc   : > { %v1983_v47 = vpop.f32.mrf.mxu0  ;;  %v1985_v48 = vpop.f32.mrf.mxu1 }
 0x1cd   : > { %v956_v49 = vmax.f32 %v1979_v45, %v1983_v47  ;;  %v968_v54 = vmax.f32 %v1981_v46, %v1985_v48 }
 0x1ce   : > { %v1991_v51 = vpop.f32.mrf.mxu1 }
 0x1cf   : > { %966 = vmax.xlane.f32.xlu0 %v965_v50  ;;  %957 = vmax.xlane.f32.xlu1 %v956_v49 }
 0x1d0   : > { %v1993_v52 = vpop.f32.mrf.mxu1 }
 0x1d1   : > { %v971_v53 = vmax.f32 %v1991_v51, %v1993_v52 }
 0x1d2   : > { %v1999_v55 = vpop.f32.mrf.mxu1 }
 0x1d3   : > { %972 = vmax.xlane.f32.xlu0 %v971_v53  ;;  %969 = vmax.xlane.f32.xlu1 %v968_v54 }
 0x1d4   : > { %v2001_v56 = vpop.f32.mrf.mxu1 }
 0x1d5   : > { %v974_v57 = vmax.f32 %v1999_v55, %v2001_v56 }
 0x1d6   : > { %v2005_v58 = vpop.f32.mrf.mxu1 }
 0x1d7   : > { %975 = vmax.xlane.f32.xlu1 %v974_v57 }
 0x1d8   : > { %v2007_v59 = vpop.f32.mrf.mxu1 }
 0x1d9   : > { %v977_v60 = vmax.f32 %v2005_v58, %v2007_v59 }
 0x1da   : > { %v2011_v61 = vpop.f32.mrf.mxu1 }
 0x1db   : > { %978 = vmax.xlane.f32.xlu0 %v977_v60 }
 0x1dc   : > { %v2013_v62 = vpop.f32.mrf.mxu1 }
 0x1dd   : > { %v980_v63 = vmax.f32 %v2011_v61, %v2013_v62 }
 0x1df   : > { %981 = vmax.xlane.f32.xlu1 %v980_v63 }
 0x23c   : > { %v937_v0 = vpop.xlane.xlu0 %936 }
 0x23d   : > { %v2018_v1 = vsub.f32 %v1921_v16, %v937_v0  ;;  %v2021_v2 = vsub.f32 %v1923_v17, %v937_v0 }
 0x23f   : > { %v1015_v3 = vmul.f32 1.442695, %v2018_v1  ;;  %v1017_v4 = vmul.f32 1.442695, %v2021_v2 }
 0x240   : > { %v940_v5 = vpop.xlane.xlu0 %939 }
 0x241   : > { %1544 = vpow2.f32 %v1015_v3  ;;  %v2026_v6 = vsub.f32 %v1927_v19, %v940_v5  ;;  %v2029_v7 = vsub.f32 %v1929_v43, %v940_v5 }
 0x242   : > { %1546 = vpow2.f32 %v1017_v4 }
 0x243   : > { %v1019_v8 = vmul.f32 1.442695, %v2026_v6  ;;  %v1021_v9 = vmul.f32 1.442695, %v2029_v7 }
 0x244   : > { %v943_v10 = vpop.xlane.xlu1 %942 }
 0x245   : > { %1548 = vpow2.f32 %v1019_v8  ;;  %v2034_v11 = vsub.f32 %v1933_v36, %v943_v10  ;;  %v2037_v12 = vsub.f32 %v1935_v21, %v943_v10 }
 0x246   : > { %1550 = vpow2.f32 %v1021_v9 }
 0x247   : > { %v1023_v13 = vmul.f32 1.442695, %v2034_v11  ;;  %v1025_v14 = vmul.f32 1.442695, %v2037_v12 }
 0x248   : > { %v946_v15 = vpop.xlane.xlu1 %945 }
 0x249   : > { %1552 = vpow2.f32 %v1023_v13  ;;  %v2042_v16 = vsub.f32 %v1939_v23, %v946_v15  ;;  %v2045_v17 = vsub.f32 %v1941_v24, %v946_v15 }
 0x24a   : > { %1554 = vpow2.f32 %v1025_v14 }
 0x24b   : > { %v1027_v18 = vmul.f32 1.442695, %v2042_v16  ;;  %v1029_v19 = vmul.f32 1.442695, %v2045_v17 }
 0x24c   : > { %v949_v43 = vpop.xlane.xlu0 %948 }
 0x24d   : > { %1556 = vpow2.f32 %v1027_v18  ;;  %v2050_v20 = vsub.f32 %v1945_v26, %v949_v43  ;;  %v2053_v36 = vsub.f32 %v1949_v28, %v949_v43 }
 0x24e   : > { %v1545_v21 = vpop.eup %1544  ;;  %1558 = vpow2.f32 %v1029_v19 }
 0x24f   : > { %v1547_v22 = vpop.eup %1546  ;;  %v1031_v23 = vmul.f32 1.442695, %v2050_v20  ;;  %v1033_v24 = vmul.f32 1.442695, %v2053_v36 }
 0x250   : > { %v961_v25 = vpop.xlane.xlu0 %960  ;;  %v952_v30 = vpop.xlane.xlu1 %951  ;;  %v1079_v35 = vadd.f32 %v1547_v22, %v1545_v21 }
 0x251   : > { %1560 = vpow2.f32 %v1031_v23  ;;  %v2058_v37 = vsub.f32 %v1947_v27, %v961_v25  ;;  %v2061_v26 = vsub.f32 %v1951_v29, %v961_v25  ;;  %v2064_v28 = vsub.f32 %v1955_v31, %v952_v30 }
 0x252   : > { %v1549_v42 = vpop.eup %1548  ;;  %1562 = vpow2.f32 %v1033_v24  ;;  %v2067_v44 = vsub.f32 %v1959_v33, %v952_v30  ;;  %1080 = vadd.xlane.f32.xlu0 %v1079_v35 }
 0x253   : > { %v1551_v49 = vpop.eup %1550  ;;  %v1047_v50 = vmul.f32 1.442695, %v2058_v37  ;;  %v1049_v53 = vmul.f32 1.442695, %v2061_v26  ;;  %v1035_v27 = vmul.f32 1.442695, %v2064_v28 }
 0x254   : > { %v1037_v54 = vmul.f32 1.442695, %v2067_v44  ;;  %v964_v29 = vpop.xlane.xlu1 %963  ;;  %v955_v57 = vpop.xlane.xlu0 %954  ;;  %v1082_v60 = vadd.f32 %v1551_v49, %v1549_v42 }
 0x255   : > { %1564 = vpow2.f32 %v1047_v50  ;;  %v2074_v31 = vsub.f32 %v1957_v32, %v964_v29  ;;  %v2077_v33 = vsub.f32 %v1961_v34, %v964_v29  ;;  %v2080_v63 = vsub.f32 %v1967_v38, %v955_v57 }
 0x256   : > { %v1553_v0 = vpop.eup %1552  ;;  %1566 = vpow2.f32 %v1049_v53  ;;  %v2083_v3 = vsub.f32 %v1971_v40, %v955_v57  ;;  %1083 = vadd.xlane.f32.xlu1 %v1082_v60 }
 0x257   : > { %v1555_v4 = vpop.eup %1554  ;;  %1568 = vpow2.f32 %v1035_v27  ;;  %v1051_v5 = vmul.f32 1.442695, %v2074_v31  ;;  %v1053_v8 = vmul.f32 1.442695, %v2077_v33  ;;  %v1039_v32 = vmul.f32 1.442695, %v2080_v63 }
 0x258   : > { %1570 = vpow2.f32 %v1037_v54  ;;  %v1041_v34 = vmul.f32 1.442695, %v2083_v3  ;;  %v967_v9 = vpop.xlane.xlu0 %966  ;;  %v958_v38 = vpop.xlane.xlu1 %957  ;;  %v1085_v10 = vadd.f32 %v1555_v4, %v1553_v0 }
 0x259   : > { %1572 = vpow2.f32 %v1051_v5  ;;  %v2090_v13 = vsub.f32 %v1969_v39, %v967_v9  ;;  %v2093_v40 = vsub.f32 %v1973_v41, %v967_v9  ;;  %v2096_v14 = vsub.f32 %v1979_v45, %v958_v38 }
 0x25a   : > { %v1557_v15 = vpop.eup %1556  ;;  %1574 = vpow2.f32 %v1053_v8  ;;  %v2099_v18 = vsub.f32 %v1983_v47, %v958_v38  ;;  %1086 = vadd.xlane.f32.xlu0 %v1085_v10 }
 0x25b   : > { %v1559_v19 = vpop.eup %1558  ;;  %1576 = vpow2.f32 %v1039_v32  ;;  %v1055_v43 = vmul.f32 1.442695, %v2090_v13  ;;  %v1057_v21 = vmul.f32 1.442695, %v2093_v40  ;;  %v1043_v39 = vmul.f32 1.442695, %v2096_v14 }
 0x25c   : > { %1578 = vpow2.f32 %v1041_v34  ;;  %v1045_v41 = vmul.f32 1.442695, %v2099_v18  ;;  %v973_v22 = vpop.xlane.xlu0 %972  ;;  %v970_v45 = vpop.xlane.xlu1 %969  ;;  %v1088_v23 = vadd.f32 %v1559_v19, %v1557_v15 }
 0x25d   : > { %1580 = vpow2.f32 %v1055_v43  ;;  %v2106_v24 = vsub.f32 %v1991_v51, %v973_v22  ;;  %v2109_v47 = vsub.f32 %v1993_v52, %v973_v22  ;;  %v2112_v25 = vsub.f32 %v1981_v46, %v970_v45 }
 0x25e   : > { %v1561_v30 = vpop.eup %1560  ;;  %1582 = vpow2.f32 %v1057_v21  ;;  %v2115_v35 = vsub.f32 %v1985_v48, %v970_v45  ;;  %1089 = vadd.xlane.f32.xlu1 %v1088_v23 }
 0x25f   : > { %v1563_v42 = vpop.eup %1562  ;;  %1584 = vpow2.f32 %v1043_v39  ;;  %v1063_v49 = vmul.f32 1.442695, %v2106_v24  ;;  %v1065_v50 = vmul.f32 1.442695, %v2109_v47  ;;  %v1059_v51 = vmul.f32 1.442695, %v2112_v25 }
 0x260   : > { %1586 = vpow2.f32 %v1045_v41  ;;  %v1061_v52 = vmul.f32 1.442695, %v2115_v35  ;;  %v976_v53 = vpop.xlane.xlu1 %975  ;;  %v1091_v46 = vadd.f32 %v1563_v42, %v1561_v30 }
 0x261   : > { %1588 = vpow2.f32 %v1063_v49  ;;  %v2122_v27 = vsub.f32 %v1999_v55, %v976_v53  ;;  %v2125_v48 = vsub.f32 %v2001_v56, %v976_v53 }
 0x262   : > { %v1565_v54 = vpop.eup %1564  ;;  %1590 = vpow2.f32 %v1065_v50  ;;  %1092 = vadd.xlane.f32.xlu0 %v1091_v46 }
 0x263   : > { %v1567_v29 = vpop.eup %1566  ;;  %1592 = vpow2.f32 %v1059_v51  ;;  %v1067_v57 = vmul.f32 1.442695, %v2122_v27  ;;  %v1069_v60 = vmul.f32 1.442695, %v2125_v48 }
 0x264   : > { %v1569_v0 = vpop.eup %1568  ;;  %1594 = vpow2.f32 %v1061_v52  ;;  %v979_v4 = vpop.xlane.xlu0 %978  ;;  %v1103_v5 = vadd.f32 %v1567_v29, %v1565_v54 }
 0x265   : > { %v1571_v8 = vpop.eup %1570  ;;  %1596 = vpow2.f32 %v1067_v57  ;;  %v2130_v55 = vsub.f32 %v2005_v58, %v979_v4  ;;  %v2133_v56 = vsub.f32 %v2007_v59, %v979_v4 }
 0x266   : > { %v1573_v32 = vpop.eup %1572  ;;  %1598 = vpow2.f32 %v1069_v60  ;;  %1104 = vadd.xlane.f32.xlu0 %v1103_v5  ;;  %v1094_v34 = vadd.f32 %v1571_v8, %v1569_v0 }
 0x267   : > { %v1575_v9 = vpop.eup %1574  ;;  %v1071_v38 = vmul.f32 1.442695, %v2130_v55  ;;  %v1073_v10 = vmul.f32 1.442695, %v2133_v56 }
 0x268   : > { %v1577_v15 = vpop.eup %1576  ;;  %1095 = vadd.xlane.f32.xlu1 %v1094_v34  ;;  %v982_v19 = vpop.xlane.xlu1 %981  ;;  %v1106_v43 = vadd.f32 %v1575_v9, %v1573_v32 }
 0x269   : > { %v1579_v21 = vpop.eup %1578  ;;  %1600 = vpow2.f32 %v1071_v38  ;;  %v2138_v58 = vsub.f32 %v2011_v61, %v982_v19  ;;  %v2141_v59 = vsub.f32 %v2013_v62, %v982_v19 }
 0x26a   : > { %v1581_v39 = vpop.eup %1580  ;;  %1602 = vpow2.f32 %v1073_v10  ;;  %v1097_v41 = vadd.f32 %v1579_v21, %v1577_v15 }
 0x26b   : > { %v1583_v22 = vpop.eup %1582  ;;  %v1075_v45 = vmul.f32 1.442695, %v2138_v58  ;;  %v1077_v23 = vmul.f32 1.442695, %v2141_v59 }
 0x26c   : > { %v1585_v30 = vpop.eup %1584  ;;  %1098 = vadd.xlane.f32.xlu0 %v1097_v41  ;;  %1107 = vadd.xlane.f32.xlu1 %v1106_v43  ;;  %v1109_v42 = vadd.f32 %v1583_v22, %v1581_v39 }
 0x26d   : > { %v1587_v49 = vpop.eup %1586  ;;  %1604 = vpow2.f32 %v1075_v45 }
 0x26e   : > { %v1589_v50 = vpop.eup %1588  ;;  %1606 = vpow2.f32 %v1077_v23  ;;  %v1100_v61 = vadd.f32 %v1587_v49, %v1585_v30 }
 0x26f   : > { %v1591_v51 = vpop.eup %1590 }
 0x270   : > { %v1593_v62 = vpop.eup %1592  ;;  %1110 = vadd.xlane.f32.xlu0 %v1109_v42  ;;  %1101 = vadd.xlane.f32.xlu1 %v1100_v61  ;;  %v1115_v52 = vadd.f32 %v1591_v51, %v1589_v50 }
 0x271   : > { %v1595_v53 = vpop.eup %1594 }
 0x272   : > { %v1597_v46 = vpop.eup %1596  ;;  %v1112_v54 = vadd.f32 %v1595_v53, %v1593_v62 }
 0x273   : > { %v1599_v29 = vpop.eup %1598 }
 0x274   : > { %1116 = vadd.xlane.f32.xlu0 %v1115_v52  ;;  %1113 = vadd.xlane.f32.xlu1 %v1112_v54  ;;  %v1118_v57 = vadd.f32 %v1599_v29, %v1597_v46 }
 0x276   : > { %v1601_v60 = vpop.eup %1600 }
 0x277   : > { %v1603_v0 = vpop.eup %1602 }
 0x278   : > { %1119 = vadd.xlane.f32.xlu1 %v1118_v57  ;;  %v1121_v4 = vadd.f32 %v1603_v0, %v1601_v60 }
 0x27a   : > { %v1605_v5 = vpop.eup %1604  ;;  %1122 = vadd.xlane.f32.xlu0 %v1121_v4 }
 0x27b   : > { %v1607_v8 = vpop.eup %1606 }
 0x27c   : > { %v1124_v32 = vadd.f32 %v1607_v8, %v1605_v5 }
 0x27e   : > { %1125 = vadd.xlane.f32.xlu1 %v1124_v32 }
 0x2db   : > { %v1081_v34 = vpop.xlane.xlu0 %1080 }
 0x2dc   : > { %1608 = vlog2.f32 %v1081_v34 }
 0x2df   : > { %v1084_v9 = vpop.xlane.xlu1 %1083 }
 0x2e0   : > { %1610 = vlog2.f32 %v1084_v9 }
 0x2e3   : > { %v1087_v38 = vpop.xlane.xlu0 %1086 }
 0x2e4   : > { %1612 = vlog2.f32 %v1087_v38 }
 0x2e7   : > { %v1090_v10 = vpop.xlane.xlu1 %1089 }
 0x2e8   : > { %1614 = vlog2.f32 %v1090_v10 }
 0x2e9   : > { %v1609_v15 = vpop.eup %1608 }
 0x2ea   : > { %v1128_v19 = vmul.f32 0.6931472, %v1609_v15 }
 0x2eb   : > { %v1093_v43 = vpop.xlane.xlu0 %1092 }
 0x2ec   : > { %v1159_v21 = vsub.f32 %v2018_v1, %v1128_v19  ;;  %v1160_v39 = vsub.f32 %v2021_v2, %v1128_v19  ;;  %1616 = vlog2.f32 %v1093_v43 }
 0x2ed   : > { %v1611_v41 = vpop.eup %1610 }
 0x2ee   : > { %1191 = vst [vmem:[%s2150_s18] sm:$0xff] %v1159_v21  ;;  %1192 = vst [vmem:[%s2150_s18 + $0x8] sm:$0xff] %v1160_v39  ;;  %v1130_v22 = vmul.f32 0.6931472, %v1611_v41 }
 0x2ef   : > { %v1105_v45 = vpop.xlane.xlu0 %1104 }
 0x2f0   : > { %v1161_v23 = vsub.f32 %v2026_v6, %v1130_v22  ;;  %v1162_v1 = vsub.f32 %v2029_v7, %v1130_v22  ;;  %1618 = vlog2.f32 %v1105_v45 }
 0x2f1   : > { %v1613_v2 = vpop.eup %1612  ;;  %v1096_v30 = vpop.xlane.xlu1 %1095 }
 0x2f2   : > { %1193 = vst [vmem:[%s2150_s18 + $0x10] sm:$0xff] %v1161_v23  ;;  %1194 = vst [vmem:[%s2150_s18 + $0x18] sm:$0xff] %v1162_v1  ;;  %v1132_v42 = vmul.f32 0.6931472, %v1613_v2  ;;  %1620 = vlog2.f32 %v1096_v30 }
 0x2f4   : > { %v1163_v49 = vsub.f32 %v2034_v11, %v1132_v42  ;;  %v1164_v50 = vsub.f32 %v2037_v12, %v1132_v42 }
 0x2f5   : > { %v1615_v61 = vpop.eup %1614  ;;  %v1099_v51 = vpop.xlane.xlu0 %1098 }
 0x2f6   : > { %v1108_v62 = vpop.xlane.xlu1 %1107  ;;  %1195 = vst [vmem:[%s2150_s18 + $0x20] sm:$0xff] %v1163_v49  ;;  %1196 = vst [vmem:[%s2150_s18 + $0x28] sm:$0xff] %v1164_v50  ;;  %v1134_v6 = vmul.f32 0.6931472, %v1615_v61  ;;  %1622 = vlog2.f32 %v1099_v51 }
 0x2f7   : > { %1624 = vlog2.f32 %v1108_v62 }
 0x2f8   : > { %v1165_v7 = vsub.f32 %v2042_v16, %v1134_v6  ;;  %v1166_v52 = vsub.f32 %v2045_v17, %v1134_v6 }
 0x2f9   : > { %v1617_v53 = vpop.eup %1616  ;;  %v1111_v46 = vpop.xlane.xlu0 %1110 }
 0x2fa   : > { %v1102_v11 = vpop.xlane.xlu1 %1101  ;;  %1197 = vst [vmem:[%s2150_s18 + $0x30] sm:$0xff] %v1165_v7  ;;  %1198 = vst [vmem:[%s2150_s18 + $0x38] sm:$0xff] %v1166_v52  ;;  %v1136_v12 = vmul.f32 0.6931472, %v1617_v53  ;;  %1626 = vlog2.f32 %v1111_v46 }
 0x2fb   : > { %1628 = vlog2.f32 %v1102_v11 }
 0x2fc   : > { %v1167_v54 = vsub.f32 %v2050_v20, %v1136_v12  ;;  %v1168_v29 = vsub.f32 %v2053_v36, %v1136_v12 }
 0x2fd   : > { %v1619_v57 = vpop.eup %1618  ;;  %v1117_v60 = vpop.xlane.xlu0 %1116 }
 0x2fe   : > { %v1114_v16 = vpop.xlane.xlu1 %1113  ;;  %1199 = vst [vmem:[%s2150_s18 + $0x40] sm:$0xff] %v1167_v54  ;;  %1200 = vst [vmem:[%s2150_s18 + $0x48] sm:$0xff] %v1168_v29  ;;  %v1144_v17 = vmul.f32 0.6931472, %v1619_v57  ;;  %1630 = vlog2.f32 %v1117_v60 }
 0x2ff   : > { %v1621_v0 = vpop.eup %1620  ;;  %1632 = vlog2.f32 %v1114_v16 }
 0x300   : > { %v1175_v4 = vsub.f32 %v2058_v37, %v1144_v17  ;;  %v1176_v5 = vsub.f32 %v2061_v26, %v1144_v17  ;;  %v1138_v8 = vmul.f32 0.6931472, %v1621_v0 }
 0x302   : > { %v1120_v20 = vpop.xlane.xlu1 %1119  ;;  %1207 = vst [vmem:[%s2150_s18 + $0x80] sm:$0xff] %v1175_v4  ;;  %1208 = vst [vmem:[%s2150_s18 + $0x88] sm:$0xff] %v1176_v5  ;;  %v1169_v36 = vsub.f32 %v2064_v28, %v1138_v8  ;;  %v1170_v32 = vsub.f32 %v2067_v44, %v1138_v8 }
 0x303   : > { %1634 = vlog2.f32 %v1120_v20  ;;  %v1623_v34 = vpop.eup %1622  ;;  %v1123_v9 = vpop.xlane.xlu0 %1122 }
 0x304   : > { %v1625_v38 = vpop.eup %1624  ;;  %1201 = vst [vmem:[%s2150_s18 + $0x50] sm:$0xff] %v1169_v36  ;;  %1202 = vst [vmem:[%s2150_s18 + $0x58] sm:$0xff] %v1170_v32  ;;  %v1140_v37 = vmul.f32 0.6931472, %v1623_v34  ;;  %1636 = vlog2.f32 %v1123_v9 }
 0x305   : > { %v1146_v26 = vmul.f32 0.6931472, %v1625_v38 }
 0x306   : > { %v1171_v10 = vsub.f32 %v2080_v63, %v1140_v37  ;;  %v1172_v15 = vsub.f32 %v2083_v3, %v1140_v37 }
 0x307   : > { %v1627_v28 = vpop.eup %1626  ;;  %v1177_v44 = vsub.f32 %v2074_v31, %v1146_v26  ;;  %v1178_v19 = vsub.f32 %v2077_v33, %v1146_v26  ;;  %v1126_v43 = vpop.xlane.xlu1 %1125 }
 0x308   : > { %v1629_v21 = vpop.eup %1628  ;;  %1203 = vst [vmem:[%s2150_s18 + $0x60] sm:$0xff] %v1171_v10  ;;  %1204 = vst [vmem:[%s2150_s18 + $0x68] sm:$0xff] %v1172_v15  ;;  %v1148_v39 = vmul.f32 0.6931472, %v1627_v28  ;;  %1638 = vlog2.f32 %v1126_v43 }
 0x309   : > { %1209 = vst [vmem:[%s2150_s18 + $0x90] sm:$0xff] %v1177_v44  ;;  %1210 = vst [vmem:[%s2150_s18 + $0x98] sm:$0xff] %v1178_v19  ;;  %v1142_v63 = vmul.f32 0.6931472, %v1629_v21 }
 0x30a   : > { %v1179_v3 = vsub.f32 %v2090_v13, %v1148_v39  ;;  %v1180_v41 = vsub.f32 %v2093_v40, %v1148_v39 }
 0x30b   : > { %v1631_v31 = vpop.eup %1630  ;;  %v1173_v33 = vsub.f32 %v2096_v14, %v1142_v63  ;;  %v1174_v22 = vsub.f32 %v2099_v18, %v1142_v63 }
 0x30c   : > { %v1633_v45 = vpop.eup %1632  ;;  %1211 = vst [vmem:[%s2150_s18 + $0xa0] sm:$0xff] %v1179_v3  ;;  %1212 = vst [vmem:[%s2150_s18 + $0xa8] sm:$0xff] %v1180_v41  ;;  %v1152_v23 = vmul.f32 0.6931472, %v1631_v31 }
 0x30d   : > { %1205 = vst [vmem:[%s2150_s18 + $0x70] sm:$0xff] %v1173_v33  ;;  %1206 = vst [vmem:[%s2150_s18 + $0x78] sm:$0xff] %v1174_v22  ;;  %v1150_v1 = vmul.f32 0.6931472, %v1633_v45 }
 0x30e   : > { %v1183_v13 = vsub.f32 %v2106_v24, %v1152_v23  ;;  %v1184_v40 = vsub.f32 %v2109_v47, %v1152_v23 }
 0x30f   : > { %v1181_v14 = vsub.f32 %v2112_v25, %v1150_v1  ;;  %v1182_v18 = vsub.f32 %v2115_v35, %v1150_v1 }
 0x310   : > { %v1635_v2 = vpop.eup %1634  ;;  %1215 = vst [vmem:[%s2150_s18 + $0xc0] sm:$0xff] %v1183_v13  ;;  %1216 = vst [vmem:[%s2150_s18 + $0xc8] sm:$0xff] %v1184_v40 }
 0x311   : > { %v1154_v30 = vmul.f32 0.6931472, %v1635_v2  ;;  %v1637_v42 = vpop.eup %1636  ;;  %1213 = vst [vmem:[%s2150_s18 + $0xb0] sm:$0xff] %v1181_v14  ;;  %1214 = vst [vmem:[%s2150_s18 + $0xb8] sm:$0xff] %v1182_v18 }
 0x312   : > { %v1156_v47 = vmul.f32 0.6931472, %v1637_v42 }
 0x313   : > { %v1185_v49 = vsub.f32 %v2122_v27, %v1154_v30  ;;  %v1186_v24 = vsub.f32 %v2125_v48, %v1154_v30 }
 0x314   : > { %v1187_v25 = vsub.f32 %v2130_v55, %v1156_v47  ;;  %v1188_v35 = vsub.f32 %v2133_v56, %v1156_v47 }
 0x315   : > { %1217 = vst [vmem:[%s2150_s18 + $0xd0] sm:$0xff] %v1185_v49  ;;  %1218 = vst [vmem:[%s2150_s18 + $0xd8] sm:$0xff] %v1186_v24  ;;  %v1639_v50 = vpop.eup %1638 }
 0x316   : > { %1219 = vst [vmem:[%s2150_s18 + $0xe0] sm:$0xff] %v1187_v25  ;;  %1220 = vst [vmem:[%s2150_s18 + $0xe8] sm:$0xff] %v1188_v35  ;;  %v1158_v61 = vmul.f32 0.6931472, %v1639_v50 }
 0x318   : > { %v1189_v27 = vsub.f32 %v2138_v58, %v1158_v61  ;;  %v1190_v48 = vsub.f32 %v2141_v59, %v1158_v61 }
 0x31a   : > { %1221 = vst [vmem:[%s2150_s18 + $0xf0] sm:$0xff] %v1189_v27  ;;  %1222 = vst [vmem:[%s2150_s18 + $0xf8] sm:$0xff] %v1190_v48 }
 0x31b   : > { %1653 = shalt.err (!%p1650_p3)
}
 0x31c   : > { %s1654_s11 = scalar_lea.hbm %s2215_s26, 4096  ;;  %s1658_s16 = scalar_lea.hbm %s2271_s6, 8192 }
 0x31d   : > { %p1655_p4 = scmp.ne.s32.totalorder %s2215_s26, %s1654_s11  ;;  %p1659_p9 = scmp.lt.s32.totalorder %s2215_s26, %s2271_s6 }
 0x31e   : > { %p1660_p10 = scmp.lt.s32.totalorder %s1658_s16, %s1654_s11 }
 0x31f   : > { %p1656_p7 = pnand %p1655_p4, %p1779_p5 }
 0x320   : > { %p1661_p11 = por %p1660_p10, %p1659_p9 }
 0x321   : > { %p1657_p8 = pneg %p1656_p7 }
 0x323   : > { %p1662_p12 = pnand %p1661_p11, %p1657_p8 }
 0x325   : > { %1665 = shalt.err (!%p1662_p12)
}
 0x326   : > { %s1704_s29 = smov 256   ;;  %s1705_s19 = smov 16  }
 0x327   : > { %1458 = dma.vmem_to_hbm [thread:$0]  (%p1779_p5), %s2217_s12, 4096, %s2215_s26, %s2225_s25, %s1704_s29, %s1704_s29, %s1705_s19  }
 0x328 PF: > { %p1464_p13 = scmp.ge.s32.totalorder %s1700_s24, 2  ;;  %s1253_s20 = sand.u32 1, %s1688_s21  }
 0x329   : > { %s1254_s28 = scalar_lea.sflag [#allocation3], %s1253_s20 }
 0x32a   : > { %p1461_p0 = pnand %p1464_p13, %p1783_p6 }
 0x32c   : > { %p1462_p1 = pneg %p1461_p0 }
 0x32e   : > { %1683 = dma.done.wait (%p1462_p1), %s1254_s28, 4096  }
 0x32f   : > { %1685 = vsyncadd (%p1462_p1), %s1254_s28, 4294963200  ;;  %p16_p2 = scmp.ge.s32.totalorder %s1766_s27, 4   ;;  %s2274_s21 = smov %s1692_s22 }
 0x330   : > { %s2275_s22 = smov %s1696_s23  ;;  %s2276_s23 = smov %s1777_s30 }
 0x331   : > { %s2277_s24 = smov %s1766_s27  ;;  %18 = sbr.rel (!%p16_p2) target bundleno = 3 (0x3), region = 82 }
 0x336   :  { %1259 = vsyncpa [#allocation3], 1 }
 0x337   :  { %1261 = vsyncpa [#allocation3 + $0x1], 1 }

</bundles_post_ra>
